<compile_context>
chip_gen: v6e
topology: v6e:2x2x1
jax: 0.10.0
libtpu: 0.0.40
codegen_flags: <defaults>
</compile_context>

<pallas_src>
import jax
import jax.numpy as jnp
from jax.experimental import pallas as pl
from jax.experimental.pallas import tpu as pltpu


def _copy_kernel(x_ref, o_ref):
    # Identity copy of one lane-dense (block_rows, lane) slab.
    o_ref[...] = x_ref[...]


# Per-operand block byte cap.  Double-buffered input + double-buffered output
# => ~4x this in VMEM, which fits every generation's scoped-VMEM default.
_MAX_BLOCK_BYTES = 2 * 1024 * 1024


def _lane_dense_layout(total_elems):
    """Pick a (rows, lane) factorization with lane a large multiple of 128."""
    for lane in (2048, 1024, 512, 256, 128):
        if total_elems % lane == 0:
            return total_elems // lane, lane
    return None


def reshape_forward(x, shape):
    """Equivalent of Reshape(args=shape)(x) for a contiguous input x."""
    b = x.shape[0]
    n_in = 1
    for d in x.shape[1:]:
        n_in *= d
    n_out = 1
    for d in shape:
        n_out *= d
    assert n_in == n_out, f"cannot view {x.shape} as (b, {shape})"

    total = b * n_in
    itemsize = jnp.dtype(x.dtype).itemsize
    layout = _lane_dense_layout(total)

    if layout is None:
        # Total element count not a multiple of 128: fall back to one
        # full-extent block (always legal; stores are masked but correct).
        rows, lane = b, n_in
        block_rows = rows
    else:
        rows, lane = layout
        max_rows = max(8, _MAX_BLOCK_BYTES // (lane * itemsize))
        if rows <= max_rows:
            # Single block covering the full slab: no per-step overhead at all.
            block_rows = rows
        else:
            # Large 8-aligned blocks; edge block (if any) is masked by Pallas.
            block_rows = max(8, (max_rows // 8) * 8)

    # Flatten to the lane-dense slab: pure metadata, preserves row-major order
    # exactly as torch .view() does on a contiguous tensor.
    x_flat = jnp.reshape(x, (rows, lane))

    grid = (pl.cdiv(rows, block_rows),)

    out_flat = pl.pallas_call(
        _copy_kernel,
        out_shape=jax.ShapeDtypeStruct((rows, lane), x.dtype),
        grid_spec=pltpu.PrefetchScalarGridSpec(
            num_scalar_prefetch=0,
            grid=grid,
            in_specs=[pl.BlockSpec((block_rows, lane), lambda i: (i, 0))],
            out_specs=pl.BlockSpec((block_rows, lane), lambda i: (i, 0)),
        ),
        # Donate the flattened input buffer: the "output" reuses the same HBM
        # allocation, so this identity copy does not allocate a second tensor.
        input_output_aliases={0: 0},
        compiler_params=pltpu.CompilerParams(
            dimension_semantics=("parallel",),
        ),
    )(x_flat)

    # Final view to the requested per-sample shape (metadata only).
    return jnp.reshape(out_flat, (b, *shape))


if __name__ == "__main__":
    key = jax.random.PRNGKey(0)
    # Input consistent with an NCHW conv feature map: (B=2, C=4, H=16, W=16)
    x = jax.random.normal(key, (2, 4, 16, 16), dtype=jnp.float32)

    # Reshape args: (16, 64)  — since 4*16*16 == 16*64
    target_shape = (16, 64)

    out = reshape_forward(x, target_shape)
    out = jax.block_until_ready(out)

    # Correctness check against plain JAX reshape (same semantics as torch.view
    # on a contiguous tensor).  `x` itself is not donated (only the internal
    # flattened copy is), so it is still valid here.
    ref = jnp.reshape(x, (x.shape[0], *target_shape))
    assert out.shape == (2, 16, 64), out.shape
    assert out.dtype == x.dtype
    assert bool(jnp.all(out == ref))

    print("KERNEL_OK")
</pallas_src>

<mosaic_0001>
module attributes {stable_mosaic.version = 11 : i64} {
  func.func @_copy_kernel(%arg0: i32, %arg1: memref<1x2048xf32, #tpu.memory_space<vmem>>, %arg2: memref<1x2048xf32, #tpu.memory_space<vmem>>) attributes {dimension_semantics = [#tpu.dimension_semantics<parallel>], iteration_bounds = array<i64: 1>, scalar_prefetch = 0 : i64, scratch_operands = 0 : i64, tpu.core_type = #tpu.core_type<tc>, window_params = [{transform_indices = @transform_0, window_bounds = array<i64: 1, 2048>}, {transform_indices = @transform_1, window_bounds = array<i64: 1, 2048>}]} {
    %c0 = arith.constant 0 : index
    %c0_0 = arith.constant 0 : index
    %0 = vector.load %arg1[%c0, %c0_0] : memref<1x2048xf32, #tpu.memory_space<vmem>>, vector<1x2048xf32>
    %c0_1 = arith.constant 0 : index
    %c0_2 = arith.constant 0 : index
    %1 = vector.load %arg2[%c0_1, %c0_2] : memref<1x2048xf32, #tpu.memory_space<vmem>>, vector<1x2048xf32>
    tpu.vector_store %arg2[%c0_1, %c0_2], %0 {strides = array<i32>} : memref<1x2048xf32, #tpu.memory_space<vmem>>, vector<1x2048xf32>,
    return
  }
  func.func @transform_0(%arg0: i32) -> (i32, i32) {
    %c0_i32 = arith.constant 0 : i32
    %c0_i32_0 = arith.constant 0 : i32
    return %arg0, %c0_i32 : i32, i32
  }
  func.func @transform_1(%arg0: i32) -> (i32, i32) {
    %c0_i32 = arith.constant 0 : i32
    %c0_i32_0 = arith.constant 0 : i32
    return %arg0, %c0_i32 : i32, i32
  }
}

</mosaic_0001>

<bundles_post_ra>
// kernel: tpu_custom_call.1
= control target key start
LH: loop header
LB: loop body
LE: loop exit
PB: predicated region body
PF: predicated region fallthrough
CT: control target
= control target key end

     0   :  { %6 = vsyncpa [#allocation3], 0  ;;  %s104_s0 = inlined_call_operand.hbm [shape: f32[1,2048], index: 0, kind: input, shape index: {}, may-alias: {0,1}]   ;;  %s105_s1 = inlined_call_operand.hbm [shape: f32[1,2048], index: 1, kind: output, shape index: {}, may-alias: {0,1}]  }
   0x1   :  { %7 = vsyncpa [#allocation4], 0  ;;  %s86_s6 = smov [#allocation2]  }
   0x2   :  { %s14_s7 = sshll.u32 %s86_s6, 4  ;;  %s15_s7 = int_to_ptr.vmem [resolvable:$true] %s14_s7 }
   0x3   :  { %s50_s8 = scalar_lea.vmem %s15_s7, 256  ;;  %p55_p1 = scmp.lt.s32.totalorder %s15_s7, %s15_s7 }
   0x4   :  { %p51_p0 = scmp.ne.s32.totalorder %s15_s7, %s50_s8  ;;  %p56_p2 = scmp.lt.s32.totalorder %s50_s8, %s50_s8 }
   0x6   :  { %p57_p3 = por %p56_p2, %p55_p1 }
   0x8   :  { %p58_p4 = pnand %p57_p3, %p51_p0 }
   0xa   :  { %61 = shalt.err (!%p58_p4)
}
   0xb   :  { %17 = dma.hbm_to_vmem [thread:$0]  %s104_s0, 256, %s15_s7, [#allocation3]  }
   0xc   :  { %82 = dma.done.wait [#allocation3], 256  }
   0xd   :  { %83 = vsyncadd [#allocation3], 4294967040  ;;  %s87_s11 = smov [#allocation5]   ;;  %v21_v0 = vld [vmem:[#allocation2] sm:$0xff]  ;;  %v22_v1 = vld [vmem:[#allocation2 + $0x8] sm:$0xff] }
   0xe   :  { %s31_s12 = sshll.u32 %s87_s11, 4  ;;  %23 = vst [vmem:[#allocation5] sm:$0xff] %v21_v0  ;;  %24 = vst [vmem:[#allocation5 + $0x8] sm:$0xff] %v22_v1  ;;  %s32_s12 = int_to_ptr.vmem [resolvable:$true] %s31_s12 }
   0xf   :  { %s62_s13 = scalar_lea.vmem %s32_s12, 256  ;;  %p67_p6 = scmp.lt.s32.totalorder %s32_s12, %s32_s12 }
  0x10   :  { %p63_p5 = scmp.ne.s32.totalorder %s32_s12, %s62_s13  ;;  %p68_p7 = scmp.lt.s32.totalorder %s62_s13, %s62_s13 }
  0x12   :  { %p69_p8 = por %p68_p7, %p67_p6 }
  0x14   :  { %p70_p9 = pnand %p69_p8, %p63_p5 }
  0x16   :  { %73 = shalt.err (!%p70_p9)
}
  0x17   :  { %34 = dma.vmem_to_hbm [thread:$0]  %s32_s12, 256, %s105_s1, [#allocation4]  }
  0x18   :  { %84 = dma.done.wait [#allocation4], 256  }
  0x19   :  { %85 = vsyncadd [#allocation4], 4294967040 }
  0x1a   :  { %38 = vsyncpa [#allocation3], 1 }
  0x1b   :  { %39 = vsyncpa [#allocation4], 1 }

</bundles_post_ra>
